<compile_context>
chip_gen: v6e
topology: v6e:2x2x1
jax: 0.10.0
libtpu: 0.0.40
codegen_flags: <defaults>
</compile_context>

<pallas_src>
import functools

import jax
import jax.numpy as jnp
from jax import lax
from jax.experimental import pallas as pl
from jax.experimental.pallas import tpu as pltpu


def _round_down(v, m):
    return (v // m) * m


def _cdiv(a, b):
    return (a + b - 1) // b


def _vmem_capacity_bytes():
    """Physical per-core VMEM; conservative fallback if the query fails."""
    try:
        cap = int(pltpu.get_tpu_info().vmem_capacity_bytes)
        if cap > 0:
            return cap
    except Exception:
        pass
    return 64 * 1024 * 1024  # v7x per-TensorCore VMEM (smallest current gen)


def _gram_kernel(f_ref, g_ref, acc_ref, *, inv_n, tk, tiles_per_core, k_total,
                 needs_mask):
    """One (core, k) grid step over the K (spatial) axis.

    f_ref   : (M, tk)    current K-tile of the features matrix (native dtype)
    g_ref   : (1, M, M)  this core-group's partial-gram output slab (f32)
    acc_ref : (M, M)     resident f32 VMEM accumulator for F @ F.T
    """
    core = pl.program_id(0)
    k = pl.program_id(1)

    @pl.when(k == 0)
    def _():
        acc_ref[...] = jnp.zeros_like(acc_ref)

    f = f_ref[...]
    if needs_mask:
        # Zero lanes past the end of K: Pallas does not zero-fill the tail of
        # a partial edge block, and fully-clamped tiles (global tile index
        # beyond the last real tile) must contribute exactly nothing.
        t = core * tiles_per_core + k              # global K-tile index
        valid = k_total - t * tk                   # columns still in range
        lane = lax.broadcasted_iota(jnp.int32, f.shape, 1)
        f = jnp.where(lane < valid, f, jnp.zeros_like(f))

    # Contract both operands over the lane (K) axis: the MXU consumes both
    # directly (no explicit transpose). Native-dtype inputs, f32 accumulation.
    acc_ref[...] += lax.dot_general(
        f, f,
        dimension_numbers=(((1,), (1,)), ((), ())),
        preferred_element_type=jnp.float32)

    @pl.when(k == tiles_per_core - 1)
    def _():
        g_ref[0] = (acc_ref[...] * inv_n).astype(g_ref.dtype)


def _pallas_gram(features, total_elems):
    """features: (M, K) in its native float dtype (bf16 stays bf16).

    Returns the (M, M) f32 gram G = (F @ F.T) / total_elems computed by a
    K-streamed Pallas kernel (no wrapper-side padding / copies of F).
    """
    M, K = features.shape
    itemsize = jnp.dtype(features.dtype).itemsize

    vmem_cap = _vmem_capacity_bytes()
    # Resident f32 buffers: accumulator + double-buffered (1, M, M) output.
    fixed = 3 * M * M * 4
    budget = int(vmem_cap * 0.6)                 # headroom for compiler internals
    per_col = 2 * M * itemsize                   # double-buffered F tile, per col
    avail = max(budget - fixed, per_col * 128)
    tk_vmem = max(128, _round_down(avail // per_col, 128))
    # Target a ~4 MiB streamed tile (amortizes ~0.35 us/step overhead), cap 8192.
    tk_target = max(128, _round_down((4 << 20) // max(M * itemsize, 1), 128))
    tk_cand = min(tk_vmem, tk_target, 8192)

    if K <= tk_cand:
        tk = K                                   # single full-extent tile, no mask
    else:
        tk = tk_cand                             # multiple of 128; edge tile masked

    n_tiles = _cdiv(K, tk)
    # Split the K reduction across a leading "parallel" axis of 2 when there is
    # enough work: ~2x on v7x (2 TCs); harmless sequential no-op on v5e/v6e.
    n_split = 2 if n_tiles >= 2 else 1
    tiles_per_core = _cdiv(n_tiles, n_split)
    needs_mask = (n_split * tiles_per_core * tk != K)

    def f_index_map(c, k):
        # Clamp: (core, k) pairs past the last real tile re-read the final tile;
        # the kernel masks their contribution to exactly zero.
        return (0, jnp.minimum(c * tiles_per_core + k, n_tiles - 1))

    kernel = functools.partial(
        _gram_kernel,
        inv_n=1.0 / float(total_elems),
        tk=tk,
        tiles_per_core=tiles_per_core,
        k_total=K,
        needs_mask=needs_mask)

    needed = fixed + 2 * M * tk * itemsize
    vmem_limit = int(min(vmem_cap, max(needed + (8 << 20), 32 << 20)))

    partials = pl.pallas_call(
        kernel,
        out_shape=jax.ShapeDtypeStruct((n_split, M, M), jnp.float32),
        grid_spec=pltpu.PrefetchScalarGridSpec(
            num_scalar_prefetch=0,
            grid=(n_split, tiles_per_core),
            in_specs=[pl.BlockSpec((M, tk), f_index_map)],
            out_specs=pl.BlockSpec((1, M, M), lambda c, k: (c, 0, 0)),
            scratch_shapes=[pltpu.VMEM((M, M), jnp.float32)]),
        compiler_params=pltpu.CompilerParams(
            dimension_semantics=("parallel", "arbitrary"),
            vmem_limit_bytes=vmem_limit),
    )(features)

    # Tiny (n_split, M, M) -> (M, M) reduction stays in the wrapper.
    return jnp.sum(partials, axis=0)


def gram_matrix(x):
    """Pallas equivalent of the PyTorch gram_matrix helper. x: (a, b, c, d)."""
    a, b, c, d = x.shape
    features = x.reshape(a * b, c * d)   # native dtype, streamed as-is (no pad)
    return _pallas_gram(features, a * b * c * d)


class StyleLoss:
    """JAX/Pallas port of the PyTorch StyleLoss module.

    Note: self.loss / self.G are Python-side stashes (mirroring the nn.Module);
    they will not survive jax.jit tracing of __call__.
    """

    def __init__(self, target_feature):
        self.target = gram_matrix(target_feature)  # "detached" by construction
        self.loss = None
        self.G = None

    def __call__(self, x):
        g = gram_matrix(x)
        # The (M, M) MSE is tiny; computing it in the wrapper frees the
        # resident in-kernel target buffers (v7x 64 MiB VMEM at large M).
        self.loss = jnp.mean((g - self.target) ** 2)
        self.G = g
        return x  # forward returns the input unchanged


if __name__ == "__main__":
    key = jax.random.PRNGKey(0)
    k_t, k_x = jax.random.split(key)

    # Small NCHW feature maps: batch=2, channels=4, spatial=16x16.
    target_feature = jax.random.normal(k_t, (2, 4, 16, 16), dtype=jnp.float32)
    x = jax.random.normal(k_x, (2, 4, 16, 16), dtype=jnp.float32)

    module = StyleLoss(target_feature)
    out = module(x)

    jax.block_until_ready(out)
    jax.block_until_ready(module.loss)
    jax.block_until_ready(module.G)

    # Pure-JAX reference check.
    def ref_gram(v):
        a, b, c, d = v.shape
        fm = v.reshape(a * b, c * d)
        return (fm @ fm.T) / (a * b * c * d)

    g_expect = ref_gram(x)
    t_expect = ref_gram(target_feature)
    loss_expect = jnp.mean((g_expect - t_expect) ** 2)

    assert jnp.allclose(module.target, t_expect, rtol=1e-5, atol=1e-5)
    assert jnp.allclose(module.G, g_expect, rtol=1e-5, atol=1e-5)
    assert jnp.allclose(module.loss, loss_expect, rtol=1e-5, atol=1e-6)
    assert jnp.array_equal(out, x)

    print("KERNEL_OK")
</pallas_src>

<mosaic_0001>
module attributes {stable_mosaic.version = 11 : i64} {
  func.func @_gram_kernel(%arg0: i32, %arg1: i32, %arg2: memref<8x256xf32, #tpu.memory_space<vmem>>, %arg3: memref<1x8x8xf32, #tpu.memory_space<vmem>>, %arg4: memref<8x8xf32, #tpu.memory_space<vmem>>) attributes {dimension_semantics = [#tpu.dimension_semantics<parallel>, #tpu.dimension_semantics<arbitrary>], iteration_bounds = array<i64: 1, 1>, scalar_prefetch = 0 : i64, scratch_operands = 1 : i64, tpu.core_type = #tpu.core_type<tc>, window_params = [{transform_indices = @transform_0, window_bounds = array<i64: 8, 256>}, {transform_indices = @transform_1, window_bounds = array<i64: 1, 8, 8>}]} {
    %c0_i32 = arith.constant 0 : i32
    %0 = arith.cmpi eq, %arg1, %c0_i32 : i32
    %1 = arith.extui %0 : i1 to i32
    %c0_i32_0 = arith.constant 0 : i32
    %2 = arith.cmpi ne, %1, %c0_i32_0 : i32
    scf.if %2 {
      %cst_8 = arith.constant 0.000000e+00 : f32
      %11 = vector.broadcast %cst_8 : f32 to vector<8x8xf32>
      %c0_9 = arith.constant 0 : index
      %c0_10 = arith.constant 0 : index
      %12 = vector.load %arg4[%c0_9, %c0_10] : memref<8x8xf32, #tpu.memory_space<vmem>>, vector<8x8xf32>
      tpu.vector_store %arg4[%c0_9, %c0_10], %11 {strides = array<i32>} : memref<8x8xf32, #tpu.memory_space<vmem>>, vector<8x8xf32>,
    } else {
    }
    %c0 = arith.constant 0 : index
    %c0_1 = arith.constant 0 : index
    %3 = vector.load %arg2[%c0, %c0_1] : memref<8x256xf32, #tpu.memory_space<vmem>>, vector<8x256xf32>
    %c0_2 = arith.constant 0 : index
    %c0_3 = arith.constant 0 : index
    %4 = vector.load %arg4[%c0_2, %c0_3] : memref<8x8xf32, #tpu.memory_space<vmem>>, vector<8x8xf32>
    %cst = arith.constant dense<0.000000e+00> : vector<8x8xf32>
    %5 = tpu.matmul %3, %3, %cst {dimension_numbers = #tpu.dot_dimension_numbers<[1], [1], [0], [0], [0, 0, 1, 0], [], []>} : vector<8x256xf32>, vector<8x256xf32>, vector<8x8xf32> -> vector<8x8xf32>
    %6 = arith.addf %4, %5 : vector<8x8xf32>
    %c0_4 = arith.constant 0 : index
    %c0_5 = arith.constant 0 : index
    %7 = vector.load %arg4[%c0_4, %c0_5] : memref<8x8xf32, #tpu.memory_space<vmem>>, vector<8x8xf32>
    tpu.vector_store %arg4[%c0_4, %c0_5], %6 {strides = array<i32>} : memref<8x8xf32, #tpu.memory_space<vmem>>, vector<8x8xf32>,
    %c0_i32_6 = arith.constant 0 : i32
    %8 = arith.cmpi eq, %arg1, %c0_i32_6 : i32
    %9 = arith.extui %8 : i1 to i32
    %c0_i32_7 = arith.constant 0 : i32
    %10 = arith.cmpi ne, %9, %c0_i32_7 : i32
    scf.if %10 {
      %c0_8 = arith.constant 0 : index
      %c0_9 = arith.constant 0 : index
      %11 = vector.load %arg4[%c0_8, %c0_9] : memref<8x8xf32, #tpu.memory_space<vmem>>, vector<8x8xf32>
      %cst_10 = arith.constant 4.8828125E-4 : f32
      %12 = vector.broadcast %cst_10 : f32 to vector<8x8xf32>
      %13 = arith.mulf %11, %12 : vector<8x8xf32>
      %c0_11 = arith.constant 0 : index
      %c0_12 = arith.constant 0 : index
      %c0_13 = arith.constant 0 : index
      %14 = vector.load %arg3[%c0_11, %c0_12, %c0_13] : memref<1x8x8xf32, #tpu.memory_space<vmem>>, vector<1x8x8xf32>
      %15 = vector.shape_cast %14 : vector<1x8x8xf32> to vector<8x8xf32>
      %16 = vector.shape_cast %13 : vector<8x8xf32> to vector<1x8x8xf32>
      tpu.vector_store %arg3[%c0_11, %c0_12, %c0_13], %16 {strides = array<i32>} : memref<1x8x8xf32, #tpu.memory_space<vmem>>, vector<1x8x8xf32>,
    } else {
    }
    return
  }
  func.func @transform_0(%arg0: i32, %arg1: i32) -> (i32, i32) {
    %c1_i32 = arith.constant 1 : i32
    %0 = arith.muli %arg0, %c1_i32 : i32
    %1 = arith.addi %0, %arg1 : i32
    %c0_i32 = arith.constant 0 : i32
    %2 = arith.minsi %1, %c0_i32 : i32
    %c0_i32_0 = arith.constant 0 : i32
    %c0_i32_1 = arith.constant 0 : i32
    return %c0_i32_0, %2 : i32, i32
  }
  func.func @transform_1(%arg0: i32, %arg1: i32) -> (i32, i32, i32) {
    %c0_i32 = arith.constant 0 : i32
    %c0_i32_0 = arith.constant 0 : i32
    %c0_i32_1 = arith.constant 0 : i32
    return %arg0, %c0_i32, %c0_i32_0 : i32, i32, i32
  }
}

</mosaic_0001>

<bundles_post_ra>
// kernel: tpu_custom_call.1
= control target key start
LH: loop header
LB: loop body
LE: loop exit
PB: predicated region body
PF: predicated region fallthrough
CT: control target
= control target key end

     0   :  { %6 = vsyncpa [#allocation4], 0  ;;  %s205_s0 = inlined_call_operand.hbm [shape: f32[8,256], index: 0, kind: input, shape index: {}]   ;;  %s206_s1 = inlined_call_operand.hbm [shape: f32[1,8,8], index: 1, kind: output, shape index: {}]  }
   0x1   :  { %7 = vsyncpa [#allocation5], 0  ;;  %s183_s6 = smov [#allocation3]  }
   0x2   :  { %s20_s7 = sshll.u32 %s183_s6, 4  ;;  %s21_s7 = int_to_ptr.vmem [resolvable:$true] %s20_s7 }
   0x3   :  { %s147_s8 = scalar_lea.vmem %s21_s7, 256  ;;  %p152_p1 = scmp.lt.s32.totalorder %s21_s7, %s21_s7 }
   0x4   :  { %p148_p0 = scmp.ne.s32.totalorder %s21_s7, %s147_s8  ;;  %p153_p2 = scmp.lt.s32.totalorder %s147_s8, %s147_s8 }
   0x6   :  { %p154_p3 = por %p153_p2, %p152_p1 }
   0x8   :  { %p155_p4 = pnand %p154_p3, %p148_p0 }
   0xa   :  { %158 = shalt.err (!%p155_p4)
}
   0xb   :  { %23 = dma.hbm_to_vmem [thread:$0]  %s205_s0, 256, %s21_s7, [#allocation4]  }
   0xc   :  { %179 = dma.done.wait [#allocation4], 256  }
   0xd   :  { %180 = vsyncadd [#allocation4], 4294967040  ;;  %vm35_vm0 = vcmask 64512   ;;  %v184_v0 = vmov 0.0   ;;  %v38_v1 = vld [vmem:[#allocation3 + $0x8] sm:$0xff]  ;;  %v37_v2 = vld [vmem:[#allocation3] sm:$0xff] }
   0xe   :  { %36 = vst.msk [vmem:[#allocation2] sm:$0xff] %vm35_vm0, %v184_v0  ;;  %70 = vmatprep.subr.mxu0 %v38_v1  ;;  %104 = vmatprep.mubr.f32.mxu0 %v38_v1  ;;  %s185_s11 = smov [#allocation6]  }
   0xf   :  { %71 = vmatpush1.xpose.msra.mxu0 %v37_v2  ;;  %s125_s0 = sshll.u32 %s185_s11, 4  ;;  %s126_s0 = int_to_ptr.vmem [resolvable:$true] %s125_s0 }
  0x10   :  { %s159_s12 = scalar_lea.vmem %s126_s0, 128  ;;  %p164_p6 = scmp.lt.s32.totalorder %s126_s0, %s126_s0 }
  0x11   :  { %p160_p5 = scmp.ne.s32.totalorder %s126_s0, %s159_s12  ;;  %p165_p7 = scmp.lt.s32.totalorder %s159_s12, %s159_s12 }
  0x12   :  { %105 = vmatmul.mubr.f32.vlgmr.msra.gmra.mxu0 %v37_v2 }
  0x13   :  { %p166_p8 = por %p165_p7, %p164_p6 }
  0x15   :  { %v39_v3 = vld [vmem:[#allocation2] sm:$0xff]  ;;  %p167_p9 = pnand %p166_p8, %p160_p5 }
  0xd2   :  { %v106_v4 = vpop.f32.mrf.mxu0 }
  0xd3   :  { %v110_v5 = vadd.f32 %v106_v4, %v39_v3 }
  0xd4   :  { %v108_v6 = vpop.f32.mrf.mxu0 }
  0xd5   :  { %112 = vst.msk [vmem:[#allocation2] sm:$0xff] %vm35_vm0, %v110_v5 }
  0xdc   :  { %v116_v7 = vld [vmem:[#allocation2] sm:$0xff] }
  0xdd   :  { %v117_v8 = vmul.f32 0.00048828125, %v116_v7 }
  0xdf   :  { %118 = vst.msk [vmem:[#allocation6] sm:$0xff] %vm35_vm0, %v117_v8 }
  0xe0   :  { %170 = shalt.err (!%p167_p9)
}
  0xe1   :  { %128 = dma.vmem_to_hbm [thread:$0]  %s126_s0, 128, %s206_s1, [#allocation5]  }
  0xe2   :  { %181 = dma.done.wait [#allocation5], 128  }
  0xe3   :  { %182 = vsyncadd [#allocation5], 4294967168 }
  0xe4   :  { %132 = vsyncpa [#allocation4], 1 }
  0xe5   :  { %133 = vsyncpa [#allocation5], 1 }

</bundles_post_ra>
